<compile_context>
chip_gen: v5e
topology: v5e:2x2
jax: 0.10.0
libtpu: 0.0.40
codegen_flags: <defaults>
</compile_context>

<pallas_src>
import jax
import jax.numpy as jnp
from jax.experimental import pallas as pl
from jax.experimental.pallas import tpu as pltpu

LANE = 128                       # lane width: keep channel dims lane-dense
_VMEM_LIMIT = 32 * 1024 * 1024   # explicit scoped-VMEM budget (safe on v5e/v6e/v7x)


def _round_up(x, m):
    return (x + m - 1) // m * m


# ----------------------------------------------------------------------------
# Kernel 1: row-tiled matmul + bias (conv7x7 as im2col-matmul, BN pre-folded)
# ----------------------------------------------------------------------------
def _matmul_bias_kernel(x_ref, w_ref, b_ref, o_ref):
    acc = jnp.dot(x_ref[...], w_ref[...], preferred_element_type=jnp.float32)
    o_ref[...] = (acc + b_ref[...]).astype(o_ref.dtype)


def matmul_bias(x, w, b, out_dtype=jnp.bfloat16, tm_max=1024):
    """x:(M,K) bf16, w:(K,N) bf16 (resident), b:(1,N) f32 (resident) -> (M,N).

    Row-tiled over M with double-buffered BlockSpec pipelining; TM capped at
    1024 so 2x(in+out) buffers stay far below v7x's 64 MiB VMEM; the M axis is
    "parallel" so both v7x TensorCores get tiles (harmless on v5e/v6e).
    """
    M, K = x.shape
    _, N = w.shape
    TM = min(tm_max, _round_up(M, 32))
    Mp = _round_up(M, TM)
    if Mp != M:
        x = jnp.pad(x, ((0, Mp - M), (0, 0)))
    out = pl.pallas_call(
        _matmul_bias_kernel,
        out_shape=jax.ShapeDtypeStruct((Mp, N), out_dtype),
        grid=(Mp // TM,),
        in_specs=[
            pl.BlockSpec((TM, K), lambda i: (i, 0)),
            pl.BlockSpec((K, N), lambda i: (0, 0)),   # weights stay resident
            pl.BlockSpec((1, N), lambda i: (0, 0)),   # bias stays resident
        ],
        out_specs=pl.BlockSpec((TM, N), lambda i: (i, 0)),
        compiler_params=pltpu.CompilerParams(
            dimension_semantics=("parallel",),
            vmem_limit_bytes=_VMEM_LIMIT,
        ),
    )(x, w, b)
    return out[:M]


# ----------------------------------------------------------------------------
# Kernel 2: fused MaxPool2d(3, s=2, p=1) + Conv2d(1x1)
# ----------------------------------------------------------------------------
def _pool_conv1x1_kernel(ph_ref, w_ref, b_ref, o_ref):
    """ph_ref : (4, 1, H2+1, W2+1, C) bf16  stride-2 phase slabs (-inf padded)
       w_ref  : (C, Co) bf16               resident 1x1-conv weight
       b_ref  : (1, Co) f32                resident bias
       o_ref  : (1, H2, W2, Co) f32
    """
    H2, W2 = o_ref.shape[1], o_ref.shape[2]
    w = w_ref[...]
    b = b_ref[...]
    for h in range(H2):                       # static, unrolled
        m = None
        for kh in range(3):
            for kw in range(3):
                p = (kh % 2) * 2 + (kw % 2)   # which stride-2 phase slab
                oh, ow = kh // 2, kw // 2     # offset inside the phase slab
                v = ph_ref[p, 0, h + oh, ow:ow + W2, :].astype(jnp.float32)
                m = v if m is None else jnp.maximum(m, v)
        acc = jnp.dot(m.astype(jnp.bfloat16), w,
                      preferred_element_type=jnp.float32)    # (W2, Co)
        o_ref[0, h, :, :] = acc + b


def maxpool_conv1x1(phases, w, b):
    """phases:(4,N,H2+1,W2+1,C) bf16 -> (N, H2, W2, Co) f32."""
    _, N, H2p, W2p, C = phases.shape
    H2, W2 = H2p - 1, W2p - 1
    Co = w.shape[1]
    return pl.pallas_call(
        _pool_conv1x1_kernel,
        out_shape=jax.ShapeDtypeStruct((N, H2, W2, Co), jnp.float32),
        grid=(N,),
        in_specs=[
            pl.BlockSpec((4, 1, H2p, W2p, C), lambda n: (0, n, 0, 0, 0)),
            pl.BlockSpec((C, Co), lambda n: (0, 0)),   # resident weights
            pl.BlockSpec((1, Co), lambda n: (0, 0)),   # resident bias
        ],
        out_specs=pl.BlockSpec((1, H2, W2, Co), lambda n: (n, 0, 0, 0)),
        compiler_params=pltpu.CompilerParams(
            dimension_semantics=("parallel",),
            vmem_limit_bytes=_VMEM_LIMIT,
        ),
    )(phases, w, b)


# ----------------------------------------------------------------------------
# Glue (pure layout work in XLA, no FLOPs)
# ----------------------------------------------------------------------------
def im2col_nchw(x, k, stride, pad):
    """x:(N,C,H,W) -> cols:(N*Ho*Wo, C*k*k) with (C, kh, kw) flattening,
    matching PyTorch weight.reshape(out_c, C*k*k)."""
    N, C, H, W = x.shape
    Ho = (H + 2 * pad - k) // stride + 1
    Wo = (W + 2 * pad - k) // stride + 1
    xp = jnp.pad(x, ((0, 0), (0, 0), (pad, pad), (pad, pad)))
    patches = []
    for kh in range(k):
        for kw in range(k):
            patches.append(
                xp[:, :, kh:kh + stride * (Ho - 1) + 1:stride,
                         kw:kw + stride * (Wo - 1) + 1:stride])
    cols = jnp.stack(patches, axis=2)                 # (N, C, k*k, Ho, Wo)
    cols = cols.transpose(0, 3, 4, 1, 2)              # (N, Ho, Wo, C, k*k)
    return cols.reshape(N * Ho * Wo, C * k * k), Ho, Wo


def pool_phases(y):
    """(N,H1,W1,C) -> (4, N, H2+1, W2+1, C) stride-2 phase slabs of the
    (-inf)-padded activation.  Every 3x3/s2/p1 pooling tap becomes a
    *contiguous* in-kernel slice of one of these 4 slabs (~1x the data in HBM
    instead of 9 shifted window copies)."""
    N, H1, W1, C = y.shape
    H2 = (H1 - 1) // 2 + 1
    W2 = (W1 - 1) // 2 + 1
    yp = jnp.pad(y, ((0, 0), (1, 1), (1, 1), (0, 0)),
                 constant_values=-jnp.inf)
    slabs = []
    for ph in range(2):
        for pw in range(2):
            p = yp[:, ph::2, pw::2, :]
            p = jnp.pad(p, ((0, 0), (0, H2 + 1 - p.shape[1]),
                            (0, W2 + 1 - p.shape[2]), (0, 0)),
                        constant_values=-jnp.inf)
            slabs.append(p)
    return jnp.stack(slabs, axis=0)


# ----------------------------------------------------------------------------
# Forward pass (conv_embedding, patch_size == 4  ->  final_ks == 1)
# ----------------------------------------------------------------------------
def conv_embedding_forward(x, params):
    N, Cin, H, W = x.shape
    eps = 1e-5
    out_c = params["w2"].shape[0]

    # --- Conv2d(Cin,32,7,2,2) + BatchNorm2d(32) (eval) as one bf16 matmul ---
    cols, H1, W1 = im2col_nchw(x, k=7, stride=2, pad=2)       # (N*H1*W1, Cin*49)
    K = cols.shape[1]
    Kp = _round_up(K, 128)        # 196 -> 256: aligned MXU reduction dim
    Cmid = LANE                   # 32 -> 128: lane-dense channel dim

    s = params["bn_gamma"] / jnp.sqrt(params["bn_var"] + eps)
    w1 = params["w1"].reshape(32, K).T * s[None, :]                     # BN folded
    b1 = params["b1"] * s + params["bn_beta"] - params["bn_mean"] * s
    cols = jnp.pad(cols, ((0, 0), (0, Kp - K))).astype(jnp.bfloat16)
    w1 = jnp.pad(w1, ((0, Kp - K), (0, Cmid - 32))).astype(jnp.bfloat16)
    b1 = jnp.pad(b1, (0, Cmid - 32)).reshape(1, Cmid).astype(jnp.float32)
    # TODO(synk): the im2col columns are still materialized by XLA (in bf16,
    # half the bytes); a fully in-kernel tap-reduction conv would remove even
    # that HBM round trip.

    y = matmul_bias(cols, w1, b1, out_dtype=jnp.bfloat16)     # (N*H1*W1, 128)
    y = y.reshape(N, H1, W1, Cmid)                            # NHWC, padded C

    # --- MaxPool2d(3,2,1) + Conv2d(32,out_c,1,1), fused in one kernel ---
    phases = pool_phases(y)                    # (4, N, H2+1, W2+1, 128) bf16
    Cout = _round_up(out_c, LANE)
    w2 = params["w2"].reshape(out_c, 32).T
    w2 = jnp.pad(w2, ((0, Cmid - 32), (0, Cout - out_c))).astype(jnp.bfloat16)
    b2 = jnp.pad(params["b2"], (0, Cout - out_c)).reshape(1, Cout).astype(jnp.float32)

    z = maxpool_conv1x1(phases, w2, b2)        # (N, H2, W2, Cout) f32
    return z[..., :out_c].transpose(0, 3, 1, 2)               # back to NCHW


# ----------------------------------------------------------------------------
# Pure-XLA f32 reference (eval-mode BN) -- used only for a loose sanity check
# ----------------------------------------------------------------------------
def reference_forward(x, params):
    eps = 1e-5
    y = jax.lax.conv_general_dilated(
        x, params["w1"], window_strides=(2, 2), padding=((2, 2), (2, 2)),
        dimension_numbers=("NCHW", "OIHW", "NCHW"))
    y = y + params["b1"][None, :, None, None]
    s = params["bn_gamma"] / jnp.sqrt(params["bn_var"] + eps)
    y = (y - params["bn_mean"][None, :, None, None]) * s[None, :, None, None] \
        + params["bn_beta"][None, :, None, None]
    y = jax.lax.reduce_window(
        y, -jnp.inf, jax.lax.max, (1, 1, 3, 3), (1, 1, 2, 2),
        padding=((0, 0), (0, 0), (1, 1), (1, 1)))
    z = jax.lax.conv_general_dilated(
        y, params["w2"], window_strides=(1, 1), padding="VALID",
        dimension_numbers=("NCHW", "OIHW", "NCHW"))
    return z + params["b2"][None, :, None, None]


# ----------------------------------------------------------------------------
# Deterministic parameter init (shapes from the module's __init__)
# ----------------------------------------------------------------------------
def init_params(key, in_channels, out_channels, patch_size):
    assert patch_size == 4, "this script instantiates the final_ks == 1 branch"
    ks = jax.random.split(key, 8)
    fan1 = float(in_channels * 7 * 7)
    w1 = jax.random.uniform(ks[0], (32, in_channels, 7, 7), jnp.float32,
                            -1.0, 1.0) / jnp.sqrt(fan1)
    b1 = jax.random.uniform(ks[1], (32,), jnp.float32, -1.0, 1.0) / jnp.sqrt(fan1)
    bn_gamma = jax.random.uniform(ks[2], (32,), jnp.float32, 0.5, 1.5)
    bn_beta = jax.random.uniform(ks[3], (32,), jnp.float32, -0.5, 0.5)
    bn_mean = jax.random.uniform(ks[4], (32,), jnp.float32, -0.5, 0.5)
    bn_var = jax.random.uniform(ks[5], (32,), jnp.float32, 0.5, 1.5)
    fan2 = 32.0
    w2 = jax.random.uniform(ks[6], (out_channels, 32, 1, 1), jnp.float32,
                            -1.0, 1.0) / jnp.sqrt(fan2)
    b2 = jax.random.uniform(ks[7], (out_channels,), jnp.float32,
                            -1.0, 1.0) / jnp.sqrt(fan2)
    # TODO(synk): train-mode BatchNorm (batch statistics) not implemented;
    # eval-mode running-stats semantics are used and folded into the conv.
    return dict(w1=w1, b1=b1, bn_gamma=bn_gamma, bn_beta=bn_beta,
                bn_mean=bn_mean, bn_var=bn_var, w2=w2, b2=b2)


if __name__ == "__main__":
    key = jax.random.PRNGKey(0)
    kx, kp = jax.random.split(key)

    in_channels, out_channels, patch_size = 4, 64, 4
    x = jax.random.normal(kx, (2, in_channels, 16, 16), dtype=jnp.float32)
    params = init_params(kp, in_channels, out_channels, patch_size)

    fwd = jax.jit(lambda xx: conv_embedding_forward(xx, params))
    out = fwd(x)
    jax.block_until_ready(out)

    # 16 -> conv7 s2 p2 -> 7 -> maxpool3 s2 p1 -> 4 -> conv1x1 s1 -> 4
    assert out.shape == (2, out_channels, 4, 4), out.shape
    assert out.dtype == jnp.float32
    assert bool(jnp.isfinite(out).all())

    # Loose sanity check vs a pure-XLA f32 reference (bf16 MXU => loose tol).
    ref = jax.jit(lambda xx: reference_forward(xx, params))(x)
    err = float(jnp.max(jnp.abs(out - ref)))
    assert err < 0.25, f"max abs err vs reference: {err}"

    print("KERNEL_OK")
</pallas_src>

<mosaic_0001>
module attributes {stable_mosaic.version = 11 : i64} {
  func.func @_matmul_bias_kernel(%arg0: i32, %arg1: memref<128x256xbf16, #tpu.memory_space<vmem>>, %arg2: memref<256x128xbf16, #tpu.memory_space<vmem>>, %arg3: memref<1x128xf32, #tpu.memory_space<vmem>>, %arg4: memref<128x128xbf16, #tpu.memory_space<vmem>>) attributes {dimension_semantics = [#tpu.dimension_semantics<parallel>], iteration_bounds = array<i64: 1>, scalar_prefetch = 0 : i64, scratch_operands = 0 : i64, tpu.core_type = #tpu.core_type<tc>, window_params = [{transform_indices = @transform_0, window_bounds = array<i64: 128, 256>}, {pipeline_mode = #tpu.pipeline_mode<synchronous>, transform_indices = @transform_1, window_bounds = array<i64: 256, 128>}, {pipeline_mode = #tpu.pipeline_mode<synchronous>, transform_indices = @transform_2, window_bounds = array<i64: 1, 128>}, {transform_indices = @transform_3, window_bounds = array<i64: 128, 128>}]} {
    %c0 = arith.constant 0 : index
    %c0_0 = arith.constant 0 : index
    %0 = vector.load %arg1[%c0, %c0_0] : memref<128x256xbf16, #tpu.memory_space<vmem>>, vector<128x256xbf16>
    %c0_1 = arith.constant 0 : index
    %c0_2 = arith.constant 0 : index
    %1 = vector.load %arg2[%c0_1, %c0_2] : memref<256x128xbf16, #tpu.memory_space<vmem>>, vector<256x128xbf16>
    %cst = arith.constant dense<0.000000e+00> : vector<128x128xf32>
    %2 = tpu.matmul %0, %1, %cst {dimension_numbers = #tpu.dot_dimension_numbers<[1], [0], [0], [1], [0, 0, 1, 1], [], []>} : vector<128x256xbf16>, vector<256x128xbf16>, vector<128x128xf32> -> vector<128x128xf32>
    %c0_3 = arith.constant 0 : index
    %c0_4 = arith.constant 0 : index
    %3 = vector.load %arg3[%c0_3, %c0_4] : memref<1x128xf32, #tpu.memory_space<vmem>>, vector<1x128xf32>
    %4 = vector.broadcast %3 : vector<1x128xf32> to vector<128x128xf32>
    %5 = arith.addf %2, %4 : vector<128x128xf32>
    %6 = arith.truncf %5 : vector<128x128xf32> to vector<128x128xbf16>
    %c0_5 = arith.constant 0 : index
    %c0_6 = arith.constant 0 : index
    %7 = vector.load %arg4[%c0_5, %c0_6] : memref<128x128xbf16, #tpu.memory_space<vmem>>, vector<128x128xbf16>
    tpu.vector_store %arg4[%c0_5, %c0_6], %6 {strides = array<i32>} : memref<128x128xbf16, #tpu.memory_space<vmem>>, vector<128x128xbf16>,
    return
  }
  func.func @transform_0(%arg0: i32) -> (i32, i32) {
    %c0_i32 = arith.constant 0 : i32
    %c0_i32_0 = arith.constant 0 : i32
    return %arg0, %c0_i32 : i32, i32
  }
  func.func @transform_1(%arg0: i32) -> (i32, i32) {
    %c0_i32 = arith.constant 0 : i32
    %c0_i32_0 = arith.constant 0 : i32
    %c0_i32_1 = arith.constant 0 : i32
    return %c0_i32, %c0_i32_0 : i32, i32
  }
  func.func @transform_2(%arg0: i32) -> (i32, i32) {
    %c0_i32 = arith.constant 0 : i32
    %c0_i32_0 = arith.constant 0 : i32
    %c0_i32_1 = arith.constant 0 : i32
    return %c0_i32, %c0_i32_0 : i32, i32
  }
  func.func @transform_3(%arg0: i32) -> (i32, i32) {
    %c0_i32 = arith.constant 0 : i32
    %c0_i32_0 = arith.constant 0 : i32
    return %arg0, %c0_i32 : i32, i32
  }
}

module attributes {stable_mosaic.version = 11 : i64} {
  func.func @_pool_conv1x1_kernel(%arg0: i32, %arg1: memref<4x1x5x5x128xbf16, #tpu.memory_space<vmem>>, %arg2: memref<128x128xbf16, #tpu.memory_space<vmem>>, %arg3: memref<1x128xf32, #tpu.memory_space<vmem>>, %arg4: memref<1x4x4x128xf32, #tpu.memory_space<vmem>>) attributes {dimension_semantics = [#tpu.dimension_semantics<parallel>], iteration_bounds = array<i64: 2>, scalar_prefetch = 0 : i64, scratch_operands = 0 : i64, tpu.core_type = #tpu.core_type<tc>, window_params = [{transform_indices = @transform_0, window_bounds = array<i64: 4, 1, 5, 5, 128>}, {pipeline_mode = #tpu.pipeline_mode<synchronous>, transform_indices = @transform_1, window_bounds = array<i64: 128, 128>}, {pipeline_mode = #tpu.pipeline_mode<synchronous>, transform_indices = @transform_2, window_bounds = array<i64: 1, 128>}, {transform_indices = @transform_3, window_bounds = array<i64: 1, 4, 4, 128>}]} {
    %c0 = arith.constant 0 : index
    %c0_0 = arith.constant 0 : index
    %0 = vector.load %arg2[%c0, %c0_0] : memref<128x128xbf16, #tpu.memory_space<vmem>>, vector<128x128xbf16>
    %c0_1 = arith.constant 0 : index
    %c0_2 = arith.constant 0 : index
    %1 = vector.load %arg3[%c0_1, %c0_2] : memref<1x128xf32, #tpu.memory_space<vmem>>, vector<1x128xf32>
    %c0_3 = arith.constant 0 : index
    %c0_4 = arith.constant 0 : index
    %c0_5 = arith.constant 0 : index
    %c0_6 = arith.constant 0 : index
    %c0_7 = arith.constant 0 : index
    %2 = vector.load %arg1[%c0_3, %c0_4, %c0_5, %c0_6, %c0_7] : memref<4x1x5x5x128xbf16, #tpu.memory_space<vmem>>, vector<1x1x1x4x128xbf16>
    %3 = vector.shape_cast %2 : vector<1x1x1x4x128xbf16> to vector<4x128xbf16>
    %4 = arith.extf %3 : vector<4x128xbf16> to vector<4x128xf32>
    %c1 = arith.constant 1 : index
    %c0_8 = arith.constant 0 : index
    %c0_9 = arith.constant 0 : index
    %c0_10 = arith.constant 0 : index
    %c0_11 = arith.constant 0 : index
    %5 = vector.load %arg1[%c1, %c0_8, %c0_9, %c0_10, %c0_11] : memref<4x1x5x5x128xbf16, #tpu.memory_space<vmem>>, vector<1x1x1x4x128xbf16>
    %6 = vector.shape_cast %5 : vector<1x1x1x4x128xbf16> to vector<4x128xbf16>
    %7 = arith.extf %6 : vector<4x128xbf16> to vector<4x128xf32>
    %8 = arith.maximumf %4, %7 : vector<4x128xf32>
    %c0_12 = arith.constant 0 : index
    %c0_13 = arith.constant 0 : index
    %c0_14 = arith.constant 0 : index
    %c1_15 = arith.constant 1 : index
    %c0_16 = arith.constant 0 : index
    %9 = vector.load %arg1[%c0_12, %c0_13, %c0_14, %c1_15, %c0_16] : memref<4x1x5x5x128xbf16, #tpu.memory_space<vmem>>, vector<1x1x1x4x128xbf16>
    %10 = vector.shape_cast %9 : vector<1x1x1x4x128xbf16> to vector<4x128xbf16>
    %11 = arith.extf %10 : vector<4x128xbf16> to vector<4x128xf32>
    %12 = arith.maximumf %8, %11 : vector<4x128xf32>
    %c2 = arith.constant 2 : index
    %c0_17 = arith.constant 0 : index
    %c0_18 = arith.constant 0 : index
    %c0_19 = arith.constant 0 : index
    %c0_20 = arith.constant 0 : index
    %13 = vector.load %arg1[%c2, %c0_17, %c0_18, %c0_19, %c0_20] : memref<4x1x5x5x128xbf16, #tpu.memory_space<vmem>>, vector<1x1x1x4x128xbf16>
    %14 = vector.shape_cast %13 : vector<1x1x1x4x128xbf16> to vector<4x128xbf16>
    %15 = arith.extf %14 : vector<4x128xbf16> to vector<4x128xf32>
    %16 = arith.maximumf %12, %15 : vector<4x128xf32>
    %c3 = arith.constant 3 : index
    %c0_21 = arith.constant 0 : index
    %c0_22 = arith.constant 0 : index
    %c0_23 = arith.constant 0 : index
    %c0_24 = arith.constant 0 : index
    %17 = vector.load %arg1[%c3, %c0_21, %c0_22, %c0_23, %c0_24] : memref<4x1x5x5x128xbf16, #tpu.memory_space<vmem>>, vector<1x1x1x4x128xbf16>
    %18 = vector.shape_cast %17 : vector<1x1x1x4x128xbf16> to vector<4x128xbf16>
    %19 = arith.extf %18 : vector<4x128xbf16> to vector<4x128xf32>
    %20 = arith.maximumf %16, %19 : vector<4x128xf32>
    %c2_25 = arith.constant 2 : index
    %c0_26 = arith.constant 0 : index
    %c0_27 = arith.constant 0 : index
    %c1_28 = arith.constant 1 : index
    %c0_29 = arith.constant 0 : index
    %21 = vector.load %arg1[%c2_25, %c0_26, %c0_27, %c1_28, %c0_29] : memref<4x1x5x5x128xbf16, #tpu.memory_space<vmem>>, vector<1x1x1x4x128xbf16>
    %22 = vector.shape_cast %21 : vector<1x1x1x4x128xbf16> to vector<4x128xbf16>
    %23 = arith.extf %22 : vector<4x128xbf16> to vector<4x128xf32>
    %24 = arith.maximumf %20, %23 : vector<4x128xf32>
    %c0_30 = arith.constant 0 : index
    %c0_31 = arith.constant 0 : index
    %c1_32 = arith.constant 1 : index
    %c0_33 = arith.constant 0 : index
    %c0_34 = arith.constant 0 : index
    %25 = vector.load %arg1[%c0_30, %c0_31, %c1_32, %c0_33, %c0_34] : memref<4x1x5x5x128xbf16, #tpu.memory_space<vmem>>, vector<1x1x1x4x128xbf16>
    %26 = vector.shape_cast %25 : vector<1x1x1x4x128xbf16> to vector<4x128xbf16>
    %27 = arith.extf %26 : vector<4x128xbf16> to vector<4x128xf32>
    %28 = arith.maximumf %24, %27 : vector<4x128xf32>
    %c1_35 = arith.constant 1 : index
    %c0_36 = arith.constant 0 : index
    %c1_37 = arith.constant 1 : index
    %c0_38 = arith.constant 0 : index
    %c0_39 = arith.constant 0 : index
    %29 = vector.load %arg1[%c1_35, %c0_36, %c1_37, %c0_38, %c0_39] : memref<4x1x5x5x128xbf16, #tpu.memory_space<vmem>>, vector<1x1x1x4x128xbf16>
    %30 = vector.shape_cast %29 : vector<1x1x1x4x128xbf16> to vector<4x128xbf16>
    %31 = arith.extf %30 : vector<4x128xbf16> to vector<4x128xf32>
    %32 = arith.maximumf %28, %31 : vector<4x128xf32>
    %c0_40 = arith.constant 0 : index
    %c0_41 = arith.constant 0 : index
    %c1_42 = arith.constant 1 : index
    %c1_43 = arith.constant 1 : index
    %c0_44 = arith.constant 0 : index
    %33 = vector.load %arg1[%c0_40, %c0_41, %c1_42, %c1_43, %c0_44] : memref<4x1x5x5x128xbf16, #tpu.memory_space<vmem>>, vector<1x1x1x4x128xbf16>
    %34 = vector.shape_cast %33 : vector<1x1x1x4x128xbf16> to vector<4x128xbf16>
    %35 = arith.extf %34 : vector<4x128xbf16> to vector<4x128xf32>
    %36 = arith.maximumf %32, %35 : vector<4x128xf32>
    %37 = arith.truncf %36 : vector<4x128xf32> to vector<4x128xbf16>
    %cst = arith.constant dense<0.000000e+00> : vector<4x128xf32>
    %38 = tpu.matmul %37, %0, %cst {dimension_numbers = #tpu.dot_dimension_numbers<[1], [0], [0], [1], [0, 0, 1, 1], [], []>} : vector<4x128xbf16>, vector<128x128xbf16>, vector<4x128xf32> -> vector<4x128xf32>
    %39 = vector.broadcast %1 : vector<1x128xf32> to vector<4x128xf32>
    %40 = arith.addf %38, %39 : vector<4x128xf32>
    %c0_45 = arith.constant 0 : index
    %c0_46 = arith.constant 0 : index
    %c0_47 = arith.constant 0 : index
    %c0_48 = arith.constant 0 : index
    %41 = vector.load %arg4[%c0_45, %c0_46, %c0_47, %c0_48] : memref<1x4x4x128xf32, #tpu.memory_space<vmem>>, vector<1x1x4x128xf32>
    %42 = vector.shape_cast %41 : vector<1x1x4x128xf32> to vector<4x128xf32>
    %43 = vector.shape_cast %40 : vector<4x128xf32> to vector<1x1x4x128xf32>
    tpu.vector_store %arg4[%c0_45, %c0_46, %c0_47, %c0_48], %43 {strides = array<i32>} : memref<1x4x4x128xf32, #tpu.memory_space<vmem>>, vector<1x1x4x128xf32>,
    %c0_49 = arith.constant 0 : index
    %c0_50 = arith.constant 0 : index
    %c1_51 = arith.constant 1 : index
    %c0_52 = arith.constant 0 : index
    %c0_53 = arith.constant 0 : index
    %44 = vector.load %arg1[%c0_49, %c0_50, %c1_51, %c0_52, %c0_53] : memref<4x1x5x5x128xbf16, #tpu.memory_space<vmem>>, vector<1x1x1x4x128xbf16>
    %45 = vector.shape_cast %44 : vector<1x1x1x4x128xbf16> to vector<4x128xbf16>
    %46 = arith.extf %45 : vector<4x128xbf16> to vector<4x128xf32>
    %c1_54 = arith.constant 1 : index
    %c0_55 = arith.constant 0 : index
    %c1_56 = arith.constant 1 : index
    %c0_57 = arith.constant 0 : index
    %c0_58 = arith.constant 0 : index
    %47 = vector.load %arg1[%c1_54, %c0_55, %c1_56, %c0_57, %c0_58] : memref<4x1x5x5x128xbf16, #tpu.memory_space<vmem>>, vector<1x1x1x4x128xbf16>
    %48 = vector.shape_cast %47 : vector<1x1x1x4x128xbf16> to vector<4x128xbf16>
    %49 = arith.extf %48 : vector<4x128xbf16> to vector<4x128xf32>
    %50 = arith.maximumf %46, %49 : vector<4x128xf32>
    %c0_59 = arith.constant 0 : index
    %c0_60 = arith.constant 0 : index
    %c1_61 = arith.constant 1 : index
    %c1_62 = arith.constant 1 : index
    %c0_63 = arith.constant 0 : index
    %51 = vector.load %arg1[%c0_59, %c0_60, %c1_61, %c1_62, %c0_63] : memref<4x1x5x5x128xbf16, #tpu.memory_space<vmem>>, vector<1x1x1x4x128xbf16>
    %52 = vector.shape_cast %51 : vector<1x1x1x4x128xbf16> to vector<4x128xbf16>
    %53 = arith.extf %52 : vector<4x128xbf16> to vector<4x128xf32>
    %54 = arith.maximumf %50, %53 : vector<4x128xf32>
    %c2_64 = arith.constant 2 : index
    %c0_65 = arith.constant 0 : index
    %c1_66 = arith.constant 1 : index
    %c0_67 = arith.constant 0 : index
    %c0_68 = arith.constant 0 : index
    %55 = vector.load %arg1[%c2_64, %c0_65, %c1_66, %c0_67, %c0_68] : memref<4x1x5x5x128xbf16, #tpu.memory_space<vmem>>, vector<1x1x1x4x128xbf16>
    %56 = vector.shape_cast %55 : vector<1x1x1x4x128xbf16> to vector<4x128xbf16>
    %57 = arith.extf %56 : vector<4x128xbf16> to vector<4x128xf32>
    %58 = arith.maximumf %54, %57 : vector<4x128xf32>
    %c3_69 = arith.constant 3 : index
    %c0_70 = arith.constant 0 : index
    %c1_71 = arith.constant 1 : index
    %c0_72 = arith.constant 0 : index
    %c0_73 = arith.constant 0 : index
    %59 = vector.load %arg1[%c3_69, %c0_70, %c1_71, %c0_72, %c0_73] : memref<4x1x5x5x128xbf16, #tpu.memory_space<vmem>>, vector<1x1x1x4x128xbf16>
    %60 = vector.shape_cast %59 : vector<1x1x1x4x128xbf16> to vector<4x128xbf16>
    %61 = arith.extf %60 : vector<4x128xbf16> to vector<4x128xf32>
    %62 = arith.maximumf %58, %61 : vector<4x128xf32>
    %c2_74 = arith.constant 2 : index
    %c0_75 = arith.constant 0 : index
    %c1_76 = arith.constant 1 : index
    %c1_77 = arith.constant 1 : index
    %c0_78 = arith.constant 0 : index
    %63 = vector.load %arg1[%c2_74, %c0_75, %c1_76, %c1_77, %c0_78] : memref<4x1x5x5x128xbf16, #tpu.memory_space<vmem>>, vector<1x1x1x4x128xbf16>
    %64 = vector.shape_cast %63 : vector<1x1x1x4x128xbf16> to vector<4x128xbf16>
    %65 = arith.extf %64 : vector<4x128xbf16> to vector<4x128xf32>
    %66 = arith.maximumf %62, %65 : vector<4x128xf32>
    %c0_79 = arith.constant 0 : index
    %c0_80 = arith.constant 0 : index
    %c2_81 = arith.constant 2 : index
    %c0_82 = arith.constant 0 : index
    %c0_83 = arith.constant 0 : index
    %67 = vector.load %arg1[%c0_79, %c0_80, %c2_81, %c0_82, %c0_83] : memref<4x1x5x5x128xbf16, #tpu.memory_space<vmem>>, vector<1x1x1x4x128xbf16>
    %68 = vector.shape_cast %67 : vector<1x1x1x4x128xbf16> to vector<4x128xbf16>
    %69 = arith.extf %68 : vector<4x128xbf16> to vector<4x128xf32>
    %70 = arith.maximumf %66, %69 : vector<4x128xf32>
    %c1_84 = arith.constant 1 : index
    %c0_85 = arith.constant 0 : index
    %c2_86 = arith.constant 2 : index
    %c0_87 = arith.constant 0 : index
    %c0_88 = arith.constant 0 : index
    %71 = vector.load %arg1[%c1_84, %c0_85, %c2_86, %c0_87, %c0_88] : memref<4x1x5x5x128xbf16, #tpu.memory_space<vmem>>, vector<1x1x1x4x128xbf16>
    %72 = vector.shape_cast %71 : vector<1x1x1x4x128xbf16> to vector<4x128xbf16>
    %73 = arith.extf %72 : vector<4x128xbf16> to vector<4x128xf32>
    %74 = arith.maximumf %70, %73 : vector<4x128xf32>
    %c0_89 = arith.constant 0 : index
    %c0_90 = arith.constant 0 : index
    %c2_91 = arith.constant 2 : index
    %c1_92 = arith.constant 1 : index
    %c0_93 = arith.constant 0 : index
    %75 = vector.load %arg1[%c0_89, %c0_90, %c2_91, %c1_92, %c0_93] : memref<4x1x5x5x128xbf16, #tpu.memory_space<vmem>>, vector<1x1x1x4x128xbf16>
    %76 = vector.shape_cast %75 : vector<1x1x1x4x128xbf16> to vector<4x128xbf16>
    %77 = arith.extf %76 : vector<4x128xbf16> to vector<4x128xf32>
    %78 = arith.maximumf %74, %77 : vector<4x128xf32>
    %79 = arith.truncf %78 : vector<4x128xf32> to vector<4x128xbf16>
    %cst_94 = arith.constant dense<0.000000e+00> : vector<4x128xf32>
    %80 = tpu.matmul %79, %0, %cst_94 {dimension_numbers = #tpu.dot_dimension_numbers<[1], [0], [0], [1], [0, 0, 1, 1], [], []>} : vector<4x128xbf16>, vector<128x128xbf16>, vector<4x128xf32> -> vector<4x128xf32>
    %81 = vector.broadcast %1 : vector<1x128xf32> to vector<4x128xf32>
    %82 = arith.addf %80, %81 : vector<4x128xf32>
    %c0_95 = arith.constant 0 : index
    %c1_96 = arith.constant 1 : index
    %c0_97 = arith.constant 0 : index
    %c0_98 = arith.constant 0 : index
    %83 = vector.load %arg4[%c0_95, %c1_96, %c0_97, %c0_98] : memref<1x4x4x128xf32, #tpu.memory_space<vmem>>, vector<1x1x4x128xf32>
    %84 = vector.shape_cast %83 : vector<1x1x4x128xf32> to vector<4x128xf32>
    %85 = vector.shape_cast %82 : vector<4x128xf32> to vector<1x1x4x128xf32>
    tpu.vector_store %arg4[%c0_95, %c1_96, %c0_97, %c0_98], %85 {strides = array<i32>} : memref<1x4x4x128xf32, #tpu.memory_space<vmem>>, vector<1x1x4x128xf32>,
    %c0_99 = arith.constant 0 : index
    %c0_100 = arith.constant 0 : index
    %c2_101 = arith.constant 2 : index
    %c0_102 = arith.constant 0 : index
    %c0_103 = arith.constant 0 : index
    %86 = vector.load %arg1[%c0_99, %c0_100, %c2_101, %c0_102, %c0_103] : memref<4x1x5x5x128xbf16, #tpu.memory_space<vmem>>, vector<1x1x1x4x128xbf16>
    %87 = vector.shape_cast %86 : vector<1x1x1x4x128xbf16> to vector<4x128xbf16>
    %88 = arith.extf %87 : vector<4x128xbf16> to vector<4x128xf32>
    %c1_104 = arith.constant 1 : index
    %c0_105 = arith.constant 0 : index
    %c2_106 = arith.constant 2 : index
    %c0_107 = arith.constant 0 : index
    %c0_108 = arith.constant 0 : index
    %89 = vector.load %arg1[%c1_104, %c0_105, %c2_106, %c0_107, %c0_108] : memref<4x1x5x5x128xbf16, #tpu.memory_space<vmem>>, vector<1x1x1x4x128xbf16>
    %90 = vector.shape_cast %89 : vector<1x1x1x4x128xbf16> to vector<4x128xbf16>
    %91 = arith.extf %90 : vector<4x128xbf16> to vector<4x128xf32>
    %92 = arith.maximumf %88, %91 : vector<4x128xf32>
    %c0_109 = arith.constant 0 : index
    %c0_110 = arith.constant 0 : index
    %c2_111 = arith.constant 2 : index
    %c1_112 = arith.constant 1 : index
    %c0_113 = arith.constant 0 : index
    %93 = vector.load %arg1[%c0_109, %c0_110, %c2_111, %c1_112, %c0_113] : memref<4x1x5x5x128xbf16, #tpu.memory_space<vmem>>, vector<1x1x1x4x128xbf16>
    %94 = vector.shape_cast %93 : vector<1x1x1x4x128xbf16> to vector<4x128xbf16>
    %95 = arith.extf %94 : vector<4x128xbf16> to vector<4x128xf32>
    %96 = arith.maximumf %92, %95 : vector<4x128xf32>
    %c2_114 = arith.constant 2 : index
    %c0_115 = arith.constant 0 : index
    %c2_116 = arith.constant 2 : index
    %c0_117 = arith.constant 0 : index
    %c0_118 = arith.constant 0 : index
    %97 = vector.load %arg1[%c2_114, %c0_115, %c2_116, %c0_117, %c0_118] : memref<4x1x5x5x128xbf16, #tpu.memory_space<vmem>>, vector<1x1x1x4x128xbf16>
    %98 = vector.shape_cast %97 : vector<1x1x1x4x128xbf16> to vector<4x128xbf16>
    %99 = arith.extf %98 : vector<4x128xbf16> to vector<4x128xf32>
    %100 = arith.maximumf %96, %99 : vector<4x128xf32>
    %c3_119 = arith.constant 3 : index
    %c0_120 = arith.constant 0 : index
    %c2_121 = arith.constant 2 : index
    %c0_122 = arith.constant 0 : index
    %c0_123 = arith.constant 0 : index
    %101 = vector.load %arg1[%c3_119, %c0_120, %c2_121, %c0_122, %c0_123] : memref<4x1x5x5x128xbf16, #tpu.memory_space<vmem>>, vector<1x1x1x4x128xbf16>
    %102 = vector.shape_cast %101 : vector<1x1x1x4x128xbf16> to vector<4x128xbf16>
    %103 = arith.extf %102 : vector<4x128xbf16> to vector<4x128xf32>
    %104 = arith.maximumf %100, %103 : vector<4x128xf32>
    %c2_124 = arith.constant 2 : index
    %c0_125 = arith.constant 0 : index
    %c2_126 = arith.constant 2 : index
    %c1_127 = arith.constant 1 : index
    %c0_128 = arith.constant 0 : index
    %105 = vector.load %arg1[%c2_124, %c0_125, %c2_126, %c1_127, %c0_128] : memref<4x1x5x5x128xbf16, #tpu.memory_space<vmem>>, vector<1x1x1x4x128xbf16>
    %106 = vector.shape_cast %105 : vector<1x1x1x4x128xbf16> to vector<4x128xbf16>
    %107 = arith.extf %106 : vector<4x128xbf16> to vector<4x128xf32>
    %108 = arith.maximumf %104, %107 : vector<4x128xf32>
    %c0_129 = arith.constant 0 : index
    %c0_130 = arith.constant 0 : index
    %c3_131 = arith.constant 3 : index
    %c0_132 = arith.constant 0 : index
    %c0_133 = arith.constant 0 : index
    %109 = vector.load %arg1[%c0_129, %c0_130, %c3_131, %c0_132, %c0_133] : memref<4x1x5x5x128xbf16, #tpu.memory_space<vmem>>, vector<1x1x1x4x128xbf16>
    %110 = vector.shape_cast %109 : vector<1x1x1x4x128xbf16> to vector<4x128xbf16>
    %111 = arith.extf %110 : vector<4x128xbf16> to vector<4x128xf32>
    %112 = arith.maximumf %108, %111 : vector<4x128xf32>
    %c1_134 = arith.constant 1 : index
    %c0_135 = arith.constant 0 : index
    %c3_136 = arith.constant 3 : index
    %c0_137 = arith.constant 0 : index
    %c0_138 = arith.constant 0 : index
    %113 = vector.load %arg1[%c1_134, %c0_135, %c3_136, %c0_137, %c0_138] : memref<4x1x5x5x128xbf16, #tpu.memory_space<vmem>>, vector<1x1x1x4x128xbf16>
    %114 = vector.shape_cast %113 : vector<1x1x1x4x128xbf16> to vector<4x128xbf16>
    %115 = arith.extf %114 : vector<4x128xbf16> to vector<4x128xf32>
    %116 = arith.maximumf %112, %115 : vector<4x128xf32>
    %c0_139 = arith.constant 0 : index
    %c0_140 = arith.constant 0 : index
    %c3_141 = arith.constant 3 : index
    %c1_142 = arith.constant 1 : index
    %c0_143 = arith.constant 0 : index
    %117 = vector.load %arg1[%c0_139, %c0_140, %c3_141, %c1_142, %c0_143] : memref<4x1x5x5x128xbf16, #tpu.memory_space<vmem>>, vector<1x1x1x4x128xbf16>
    %118 = vector.shape_cast %117 : vector<1x1x1x4x128xbf16> to vector<4x128xbf16>
    %119 = arith.extf %118 : vector<4x128xbf16> to vector<4x128xf32>
    %120 = arith.maximumf %116, %119 : vector<4x128xf32>
    %121 = arith.truncf %120 : vector<4x128xf32> to vector<4x128xbf16>
    %cst_144 = arith.constant dense<0.000000e+00> : vector<4x128xf32>
    %122 = tpu.matmul %121, %0, %cst_144 {dimension_numbers = #tpu.dot_dimension_numbers<[1], [0], [0], [1], [0, 0, 1, 1], [], []>} : vector<4x128xbf16>, vector<128x128xbf16>, vector<4x128xf32> -> vector<4x128xf32>
    %123 = vector.broadcast %1 : vector<1x128xf32> to vector<4x128xf32>
    %124 = arith.addf %122, %123 : vector<4x128xf32>
    %c0_145 = arith.constant 0 : index
    %c2_146 = arith.constant 2 : index
    %c0_147 = arith.constant 0 : index
    %c0_148 = arith.constant 0 : index
    %125 = vector.load %arg4[%c0_145, %c2_146, %c0_147, %c0_148] : memref<1x4x4x128xf32, #tpu.memory_space<vmem>>, vector<1x1x4x128xf32>
    %126 = vector.shape_cast %125 : vector<1x1x4x128xf32> to vector<4x128xf32>
    %127 = vector.shape_cast %124 : vector<4x128xf32> to vector<1x1x4x128xf32>
    tpu.vector_store %arg4[%c0_145, %c2_146, %c0_147, %c0_148], %127 {strides = array<i32>} : memref<1x4x4x128xf32, #tpu.memory_space<vmem>>, vector<1x1x4x128xf32>,
    %c0_149 = arith.constant 0 : index
    %c0_150 = arith.constant 0 : index
    %c3_151 = arith.constant 3 : index
    %c0_152 = arith.constant 0 : index
    %c0_153 = arith.constant 0 : index
    %128 = vector.load %arg1[%c0_149, %c0_150, %c3_151, %c0_152, %c0_153] : memref<4x1x5x5x128xbf16, #tpu.memory_space<vmem>>, vector<1x1x1x4x128xbf16>
    %129 = vector.shape_cast %128 : vector<1x1x1x4x128xbf16> to vector<4x128xbf16>
    %130 = arith.extf %129 : vector<4x128xbf16> to vector<4x128xf32>
    %c1_154 = arith.constant 1 : index
    %c0_155 = arith.constant 0 : index
    %c3_156 = arith.constant 3 : index
    %c0_157 = arith.constant 0 : index
    %c0_158 = arith.constant 0 : index
    %131 = vector.load %arg1[%c1_154, %c0_155, %c3_156, %c0_157, %c0_158] : memref<4x1x5x5x128xbf16, #tpu.memory_space<vmem>>, vector<1x1x1x4x128xbf16>
    %132 = vector.shape_cast %131 : vector<1x1x1x4x128xbf16> to vector<4x128xbf16>
    %133 = arith.extf %132 : vector<4x128xbf16> to vector<4x128xf32>
    %134 = arith.maximumf %130, %133 : vector<4x128xf32>
    %c0_159 = arith.constant 0 : index
    %c0_160 = arith.constant 0 : index
    %c3_161 = arith.constant 3 : index
    %c1_162 = arith.constant 1 : index
    %c0_163 = arith.constant 0 : index
    %135 = vector.load %arg1[%c0_159, %c0_160, %c3_161, %c1_162, %c0_163] : memref<4x1x5x5x128xbf16, #tpu.memory_space<vmem>>, vector<1x1x1x4x128xbf16>
    %136 = vector.shape_cast %135 : vector<1x1x1x4x128xbf16> to vector<4x128xbf16>
    %137 = arith.extf %136 : vector<4x128xbf16> to vector<4x128xf32>
    %138 = arith.maximumf %134, %137 : vector<4x128xf32>
    %c2_164 = arith.constant 2 : index
    %c0_165 = arith.constant 0 : index
    %c3_166 = arith.constant 3 : index
    %c0_167 = arith.constant 0 : index
    %c0_168 = arith.constant 0 : index
    %139 = vector.load %arg1[%c2_164, %c0_165, %c3_166, %c0_167, %c0_168] : memref<4x1x5x5x128xbf16, #tpu.memory_space<vmem>>, vector<1x1x1x4x128xbf16>
    %140 = vector.shape_cast %139 : vector<1x1x1x4x128xbf16> to vector<4x128xbf16>
    %141 = arith.extf %140 : vector<4x128xbf16> to vector<4x128xf32>
    %142 = arith.maximumf %138, %141 : vector<4x128xf32>
    %c3_169 = arith.constant 3 : index
    %c0_170 = arith.constant 0 : index
    %c3_171 = arith.constant 3 : index
    %c0_172 = arith.constant 0 : index
    %c0_173 = arith.constant 0 : index
    %143 = vector.load %arg1[%c3_169, %c0_170, %c3_171, %c0_172, %c0_173] : memref<4x1x5x5x128xbf16, #tpu.memory_space<vmem>>, vector<1x1x1x4x128xbf16>
    %144 = vector.shape_cast %143 : vector<1x1x1x4x128xbf16> to vector<4x128xbf16>
    %145 = arith.extf %144 : vector<4x128xbf16> to vector<4x128xf32>
    %146 = arith.maximumf %142, %145 : vector<4x128xf32>
    %c2_174 = arith.constant 2 : index
    %c0_175 = arith.constant 0 : index
    %c3_176 = arith.constant 3 : index
    %c1_177 = arith.constant 1 : index
    %c0_178 = arith.constant 0 : index
    %147 = vector.load %arg1[%c2_174, %c0_175, %c3_176, %c1_177, %c0_178] : memref<4x1x5x5x128xbf16, #tpu.memory_space<vmem>>, vector<1x1x1x4x128xbf16>
    %148 = vector.shape_cast %147 : vector<1x1x1x4x128xbf16> to vector<4x128xbf16>
    %149 = arith.extf %148 : vector<4x128xbf16> to vector<4x128xf32>
    %150 = arith.maximumf %146, %149 : vector<4x128xf32>
    %c0_179 = arith.constant 0 : index
    %c0_180 = arith.constant 0 : index
    %c4 = arith.constant 4 : index
    %c0_181 = arith.constant 0 : index
    %c0_182 = arith.constant 0 : index
    %151 = vector.load %arg1[%c0_179, %c0_180, %c4, %c0_181, %c0_182] : memref<4x1x5x5x128xbf16, #tpu.memory_space<vmem>>, vector<1x1x1x4x128xbf16>
    %152 = vector.shape_cast %151 : vector<1x1x1x4x128xbf16> to vector<4x128xbf16>
    %153 = arith.extf %152 : vector<4x128xbf16> to vector<4x128xf32>
    %154 = arith.maximumf %150, %153 : vector<4x128xf32>
    %c1_183 = arith.constant 1 : index
    %c0_184 = arith.constant 0 : index
    %c4_185 = arith.constant 4 : index
    %c0_186 = arith.constant 0 : index
    %c0_187 = arith.constant 0 : index
    %155 = vector.load %arg1[%c1_183, %c0_184, %c4_185, %c0_186, %c0_187] : memref<4x1x5x5x128xbf16, #tpu.memory_space<vmem>>, vector<1x1x1x4x128xbf16>
    %156 = vector.shape_cast %155 : vector<1x1x1x4x128xbf16> to vector<4x128xbf16>
    %157 = arith.extf %156 : vector<4x128xbf16> to vector<4x128xf32>
    %158 = arith.maximumf %154, %157 : vector<4x128xf32>
    %c0_188 = arith.constant 0 : index
    %c0_189 = arith.constant 0 : index
    %c4_190 = arith.constant 4 : index
    %c1_191 = arith.constant 1 : index
    %c0_192 = arith.constant 0 : index
    %159 = vector.load %arg1[%c0_188, %c0_189, %c4_190, %c1_191, %c0_192] : memref<4x1x5x5x128xbf16, #tpu.memory_space<vmem>>, vector<1x1x1x4x128xbf16>
    %160 = vector.shape_cast %159 : vector<1x1x1x4x128xbf16> to vector<4x128xbf16>
    %161 = arith.extf %160 : vector<4x128xbf16> to vector<4x128xf32>
    %162 = arith.maximumf %158, %161 : vector<4x128xf32>
    %163 = arith.truncf %162 : vector<4x128xf32> to vector<4x128xbf16>
    %cst_193 = arith.constant dense<0.000000e+00> : vector<4x128xf32>
    %164 = tpu.matmul %163, %0, %cst_193 {dimension_numbers = #tpu.dot_dimension_numbers<[1], [0], [0], [1], [0, 0, 1, 1], [], []>} : vector<4x128xbf16>, vector<128x128xbf16>, vector<4x128xf32> -> vector<4x128xf32>
    %165 = vector.broadcast %1 : vector<1x128xf32> to vector<4x128xf32>
    %166 = arith.addf %164, %165 : vector<4x128xf32>
    %c0_194 = arith.constant 0 : index
    %c3_195 = arith.constant 3 : index
    %c0_196 = arith.constant 0 : index
    %c0_197 = arith.constant 0 : index
    %167 = vector.load %arg4[%c0_194, %c3_195, %c0_196, %c0_197] : memref<1x4x4x128xf32, #tpu.memory_space<vmem>>, vector<1x1x4x128xf32>
    %168 = vector.shape_cast %167 : vector<1x1x4x128xf32> to vector<4x128xf32>
    %169 = vector.shape_cast %166 : vector<4x128xf32> to vector<1x1x4x128xf32>
    tpu.vector_store %arg4[%c0_194, %c3_195, %c0_196, %c0_197], %169 {strides = array<i32>} : memref<1x4x4x128xf32, #tpu.memory_space<vmem>>, vector<1x1x4x128xf32>,
    return
  }
  func.func @transform_0(%arg0: i32) -> (i32, i32, i32, i32, i32) {
    %c0_i32 = arith.constant 0 : i32
    %c0_i32_0 = arith.constant 0 : i32
    %c0_i32_1 = arith.constant 0 : i32
    %c0_i32_2 = arith.constant 0 : i32
    %c0_i32_3 = arith.constant 0 : i32
    return %c0_i32, %arg0, %c0_i32_0, %c0_i32_1, %c0_i32_2 : i32, i32, i32, i32, i32
  }
  func.func @transform_1(%arg0: i32) -> (i32, i32) {
    %c0_i32 = arith.constant 0 : i32
    %c0_i32_0 = arith.constant 0 : i32
    %c0_i32_1 = arith.constant 0 : i32
    return %c0_i32, %c0_i32_0 : i32, i32
  }
  func.func @transform_2(%arg0: i32) -> (i32, i32) {
    %c0_i32 = arith.constant 0 : i32
    %c0_i32_0 = arith.constant 0 : i32
    %c0_i32_1 = arith.constant 0 : i32
    return %c0_i32, %c0_i32_0 : i32, i32
  }
  func.func @transform_3(%arg0: i32) -> (i32, i32, i32, i32) {
    %c0_i32 = arith.constant 0 : i32
    %c0_i32_0 = arith.constant 0 : i32
    %c0_i32_1 = arith.constant 0 : i32
    %c0_i32_2 = arith.constant 0 : i32
    return %arg0, %c0_i32, %c0_i32_0, %c0_i32_1 : i32, i32, i32, i32
  }
}

</mosaic_0001>

<bundles_post_ra>
// kernel: _lambda_.2
= control target key start
LH: loop header
LB: loop body
LE: loop exit
PB: predicated region body
PF: predicated region fallthrough
CT: control target
= control target key end

     0   :  { %s809_s1 = inlined_call_operand.vmem [shape: bf16[256,128], index: 1, kind: input, shape index: {}]   ;;  %s810_s2 = inlined_call_operand.vmem [shape: f32[1,128], index: 2, kind: input, shape index: {}]   ;;  %s811_s0 = inlined_call_operand.vmem [shape: bf16[128,256], index: 0, kind: input, shape index: {}]   ;;  %s812_s3 = inlined_call_operand.vmem [shape: bf16[128,128], index: 3, kind: output, shape index: {}]  }
   0x1   :  { %v527_v0 = vld [vmem:[%s809_s1 + $0x38] sm:$0xff]  ;;  %v526_v2 = vld [vmem:[%s809_s1 + $0x30] sm:$0xff]  ;;  %v525_v4 = vld [vmem:[%s809_s1 + $0x28] sm:$0xff] }
   0x2   :  { %v535_v1 = vld [vmem:[%s809_s1 + $0x78] sm:$0xff]  ;;  %242 = vmatpush.bf16.msra.mxu0 %v527_v0  ;;  %583 = vmatpush.bf16.msra.mxu2 %v527_v0  ;;  %v534_v3 = vld [vmem:[%s809_s1 + $0x70] sm:$0xff]  ;;  %v533_v5 = vld [vmem:[%s809_s1 + $0x68] sm:$0xff] }
   0x3   :  { %291 = vmatpush.bf16.msra.mxu1 %v535_v1  ;;  %591 = vmatpush.bf16.msra.mxu3 %v535_v1  ;;  %v524_v6 = vld [vmem:[%s809_s1 + $0x20] sm:$0xff]  ;;  %v523_v8 = vld [vmem:[%s809_s1 + $0x18] sm:$0xff]  ;;  %v522_v10 = vld [vmem:[%s809_s1 + $0x10] sm:$0xff] }
   0x4   :  { %v532_v7 = vld [vmem:[%s809_s1 + $0x60] sm:$0xff]  ;;  %v531_v9 = vld [vmem:[%s809_s1 + $0x58] sm:$0xff]  ;;  %v530_v11 = vld [vmem:[%s809_s1 + $0x50] sm:$0xff] }
   0x5   :  { %v521_v12 = vld [vmem:[%s809_s1 + $0x8] sm:$0xff]  ;;  %v520_v14 = vld [vmem:[%s809_s1] sm:$0xff]  ;;  %v386_v28 = vld [vmem:[%s811_s0 + $0x10] sm:$0xf] }
   0x6   :  { %243 = vmatpush.bf16.msra.mxu0 %v526_v2  ;;  %584 = vmatpush.bf16.msra.mxu2 %v526_v2  ;;  %v529_v13 = vld [vmem:[%s809_s1 + $0x48] sm:$0xff]  ;;  %v528_v15 = vld [vmem:[%s809_s1 + $0x40] sm:$0xff]  ;;  %v507_v29 = vld [vmem:[%s811_s0 + $0x14] sm:$0xf0] }
   0x7   :  { %292 = vmatpush.bf16.msra.mxu1 %v534_v3  ;;  %592 = vmatpush.bf16.msra.mxu3 %v534_v3  ;;  %v378_v16 = vld [vmem:[%s811_s0] sm:$0xf]  ;;  %v505_v17 = vld [vmem:[%s811_s0 + $0x4] sm:$0xf0]  ;;  %v504_v20 = vld [vmem:[%s811_s0 + $0x4] sm:$0xf]  ;;  %v387_v36 = vor.u32 %v507_v29, %v386_v28 }
   0x8   :  { %v410_v18 = vld [vmem:[%s811_s0 + $0x40] sm:$0xf]  ;;  %v513_v19 = vld [vmem:[%s811_s0 + $0x44] sm:$0xf0]  ;;  %v380_v21 = vld [vmem:[%s811_s0 + $0x8] sm:$0xf0]  ;;  %v379_v24 = vor.u32 %v505_v17, %v378_v16 }
   0x9   :  { %v512_v22 = vld [vmem:[%s811_s0 + $0x44] sm:$0xf]  ;;  %v412_v23 = vld [vmem:[%s811_s0 + $0x48] sm:$0xf0]  ;;  %v411_v25 = vor.u32 %v513_v19, %v410_v18  ;;  %v383_v26 = vor.u32 %v504_v20, %v380_v21  ;;  %v418_v30 = vld [vmem:[%s811_s0 + $0x50] sm:$0xf] }
   0xa   :  { %244 = vmatpush.bf16.msra.mxu0 %v525_v4  ;;  %585 = vmatpush.bf16.msra.mxu2 %v525_v4  ;;  %v415_v27 = vor.u32 %v512_v22, %v412_v23  ;;  %v515_v31 = vld [vmem:[%s811_s0 + $0x54] sm:$0xf0]  ;;  %v506_v32 = vld [vmem:[%s811_s0 + $0x14] sm:$0xf]  ;;  %v388_v33 = vld [vmem:[%s811_s0 + $0x18] sm:$0xf0] }
   0xb   :  { %293 = vmatpush.bf16.msra.mxu1 %v533_v5  ;;  %593 = vmatpush.bf16.msra.mxu3 %v533_v5  ;;  %v514_v34 = vld [vmem:[%s811_s0 + $0x54] sm:$0xf]  ;;  %v420_v35 = vld [vmem:[%s811_s0 + $0x58] sm:$0xf0]  ;;  %v419_v37 = vor.u32 %v515_v31, %v418_v30  ;;  %v391_v38 = vor.u32 %v506_v32, %v388_v33  ;;  %v394_v40 = vld [vmem:[%s811_s0 + $0x20] sm:$0xf] }
   0xc   :  { %v423_v39 = vor.u32 %v514_v34, %v420_v35  ;;  %v509_v41 = vld [vmem:[%s811_s0 + $0x24] sm:$0xf0]  ;;  %v426_v42 = vld [vmem:[%s811_s0 + $0x60] sm:$0xf]  ;;  %v508_v44 = vld [vmem:[%s811_s0 + $0x24] sm:$0xf] }
   0xd   :  { %v517_v43 = vld [vmem:[%s811_s0 + $0x64] sm:$0xf0]  ;;  %v396_v45 = vld [vmem:[%s811_s0 + $0x28] sm:$0xf0]  ;;  %v516_v46 = vld [vmem:[%s811_s0 + $0x64] sm:$0xf]  ;;  %v395_v48 = vor.u32 %v509_v41, %v394_v40 }
   0xe   :  { %245 = vmatpush.bf16.msra.mxu0 %v524_v6  ;;  %586 = vmatpush.bf16.msra.mxu2 %v524_v6  ;;  %v428_v47 = vld [vmem:[%s811_s0 + $0x68] sm:$0xf0]  ;;  %v427_v49 = vor.u32 %v517_v43, %v426_v42  ;;  %v399_v50 = vor.u32 %v508_v44, %v396_v45  ;;  %v402_v52 = vld [vmem:[%s811_s0 + $0x30] sm:$0xf]  ;;  %v511_v53 = vld [vmem:[%s811_s0 + $0x34] sm:$0xf0] }
   0xf   :  { %294 = vmatpush.bf16.msra.mxu1 %v532_v7  ;;  %594 = vmatpush.bf16.msra.mxu3 %v532_v7  ;;  %v431_v51 = vor.u32 %v516_v46, %v428_v47  ;;  %v434_v54 = vld [vmem:[%s811_s0 + $0x70] sm:$0xf]  ;;  %v519_v55 = vld [vmem:[%s811_s0 + $0x74] sm:$0xf0]  ;;  %v510_v56 = vld [vmem:[%s811_s0 + $0x34] sm:$0xf]  ;;  %v403_v60 = vor.u32 %v511_v53, %v402_v52 }
  0x10   :  { %v404_v57 = vld [vmem:[%s811_s0 + $0x38] sm:$0xf0]  ;;  %v518_v58 = vld [vmem:[%s811_s0 + $0x74] sm:$0xf]  ;;  %v435_v61 = vor.u32 %v519_v55, %v434_v54  ;;  %v767_v2 = vld [vmem:[%s810_s2] ss:$0 sm:$0xff] }
  0x11   :  { %v436_v59 = vld [vmem:[%s811_s0 + $0x78] sm:$0xf0]  ;;  %v407_v62 = vor.u32 %v510_v56, %v404_v57 }
  0x12   :  { %246 = vmatpush.bf16.msra.mxu0 %v523_v8  ;;  %587 = vmatpush.bf16.msra.mxu2 %v523_v8  ;;  %v439_v63 = vor.u32 %v518_v58, %v436_v59 }
  0x13   :  { %295 = vmatpush.bf16.msra.mxu1 %v531_v9  ;;  %595 = vmatpush.bf16.msra.mxu3 %v531_v9 }
  0x16   :  { %247 = vmatpush.bf16.msra.mxu0 %v522_v10  ;;  %588 = vmatpush.bf16.msra.mxu2 %v522_v10 }
  0x17   :  { %296 = vmatpush.bf16.msra.mxu1 %v530_v11  ;;  %596 = vmatpush.bf16.msra.mxu3 %v530_v11 }
  0x1a   :  { %248 = vmatpush.bf16.msra.mxu0 %v521_v12  ;;  %589 = vmatpush.bf16.msra.mxu2 %v521_v12 }
  0x1b   :  { %297 = vmatpush.bf16.msra.mxu1 %v529_v13  ;;  %597 = vmatpush.bf16.msra.mxu3 %v529_v13 }
  0x1e   :  { %249 = vmatpush.bf16.msra.mxu0 %v520_v14  ;;  %590 = vmatpush.bf16.msra.mxu2 %v520_v14 }
  0x1f   :  { %298 = vmatpush.bf16.msra.mxu1 %v528_v15  ;;  %598 = vmatpush.bf16.msra.mxu3 %v528_v15 }
  0x21   :  { %250 = vmatmul.bf16.vlgmr.msra.gmra.mxu0 %v379_v24  ;;  %270 = vmatmul.bf16.vlgmr.msra.gmra.mxu2 %v411_v25 }
  0x22   :  { %299 = vmatmul.bf16.vlgmr.msra.gmra.mxu1 %v383_v26  ;;  %319 = vmatmul.bf16.vlgmr.msra.gmra.mxu3 %v415_v27 }
  0x31   :  { %255 = vmatmul.bf16.gmra.mxu0 %v387_v36  ;;  %275 = vmatmul.bf16.gmra.mxu2 %v419_v37 }
  0x32   :  { %304 = vmatmul.bf16.gmra.mxu1 %v391_v38  ;;  %324 = vmatmul.bf16.gmra.mxu3 %v423_v39 }
  0x41   :  { %260 = vmatmul.bf16.gmra.mxu0 %v395_v48  ;;  %280 = vmatmul.bf16.gmra.mxu2 %v427_v49 }
  0x42   :  { %309 = vmatmul.bf16.gmra.mxu1 %v399_v50  ;;  %329 = vmatmul.bf16.gmra.mxu3 %v431_v51 }
  0x51   :  { %265 = vmatmul.bf16.gmra.mxu0 %v403_v60  ;;  %285 = vmatmul.bf16.gmra.mxu2 %v435_v61 }
  0x52   :  { %314 = vmatmul.bf16.gmra.mxu1 %v407_v62  ;;  %334 = vmatmul.bf16.gmra.mxu3 %v439_v63 }
  0x9e   :  { %v251_v0 = vpop.f32.mrf.mxu0 }
  0x9f   :  { %v300_v1 = vpop.f32.mrf.mxu1  ;;  %v252_v4 = vadd.f32 %v767_v2, %v251_v0 }
  0xa1   :  { %v301_v9 = vadd.f32 %v300_v1, %v252_v4 }
  0xa4   :  { %v271_v3 = vpop.f32.mrf.mxu2 }
  0xa5   :  { %v320_v5 = vpop.f32.mrf.mxu3  ;;  %v272_v11 = vadd.f32 %v767_v2, %v271_v3 }
  0xa6   :  { %v253_v6 = vpop.f32.mrf.mxu0 }
  0xa7   :  { %v254_v7 = vadd.f32 %v767_v2, %v253_v6  ;;  %v302_v8 = vpop.f32.mrf.mxu1  ;;  %v321_v17 = vadd.f32 %v320_v5, %v272_v11 }
  0xa9   :  { %v303_v10 = vadd.f32 %v302_v8, %v254_v7 }
  0xab   :  { %v539_v12 = vpack.c.bf16 %v303_v10, %v301_v9 }
  0xac   :  { %v273_v13 = vpop.f32.mrf.mxu2 }
  0xad   :  { %540 = vst [vmem:[%s812_s3] sm:$0xff] %v539_v12   ;;  %v274_v14 = vadd.f32 %v767_v2, %v273_v13  ;;  %v322_v15 = vpop.f32.mrf.mxu3 }
  0xae   :  { %v256_v16 = vpop.f32.mrf.mxu0 }
  0xaf   :  { %v323_v18 = vadd.f32 %v322_v15, %v274_v14  ;;  %v305_v19 = vpop.f32.mrf.mxu1  ;;  %v257_v22 = vadd.f32 %v767_v2, %v256_v16 }
  0xb1   :  { %v559_v20 = vpack.c.bf16 %v323_v18, %v321_v17  ;;  %v306_v27 = vadd.f32 %v305_v19, %v257_v22 }
  0xb3   :  { %579 = vst [vmem:[%s812_s3 + $0x20] sm:$0xff] %v559_v20  }
  0xb4   :  { %v276_v21 = vpop.f32.mrf.mxu2 }
  0xb5   :  { %v325_v23 = vpop.f32.mrf.mxu3  ;;  %v277_v29 = vadd.f32 %v767_v2, %v276_v21 }
  0xb6   :  { %v258_v24 = vpop.f32.mrf.mxu0 }
  0xb7   :  { %v259_v25 = vadd.f32 %v767_v2, %v258_v24  ;;  %v307_v26 = vpop.f32.mrf.mxu1  ;;  %v326_v35 = vadd.f32 %v325_v23, %v277_v29 }
  0xb9   :  { %v308_v28 = vadd.f32 %v307_v26, %v259_v25 }
  0xbb   :  { %v544_v30 = vpack.c.bf16 %v308_v28, %v306_v27 }
  0xbc   :  { %v278_v31 = vpop.f32.mrf.mxu2 }
  0xbd   :  { %576 = vst [vmem:[%s812_s3 + $0x8] sm:$0xff] %v544_v30   ;;  %v279_v32 = vadd.f32 %v767_v2, %v278_v31  ;;  %v327_v33 = vpop.f32.mrf.mxu3 }
  0xbe   :  { %v261_v34 = vpop.f32.mrf.mxu0 }
  0xbf   :  { %v328_v36 = vadd.f32 %v327_v33, %v279_v32  ;;  %v310_v37 = vpop.f32.mrf.mxu1  ;;  %v262_v40 = vadd.f32 %v767_v2, %v261_v34 }
  0xc1   :  { %v564_v38 = vpack.c.bf16 %v328_v36, %v326_v35  ;;  %v311_v45 = vadd.f32 %v310_v37, %v262_v40 }
  0xc3   :  { %580 = vst [vmem:[%s812_s3 + $0x28] sm:$0xff] %v564_v38  }
  0xc4   :  { %v281_v39 = vpop.f32.mrf.mxu2 }
  0xc5   :  { %v330_v41 = vpop.f32.mrf.mxu3  ;;  %v282_v47 = vadd.f32 %v767_v2, %v281_v39 }
  0xc6   :  { %v263_v42 = vpop.f32.mrf.mxu0 }
  0xc7   :  { %v264_v43 = vadd.f32 %v767_v2, %v263_v42  ;;  %v312_v44 = vpop.f32.mrf.mxu1  ;;  %v331_v53 = vadd.f32 %v330_v41, %v282_v47 }
  0xc9   :  { %v313_v46 = vadd.f32 %v312_v44, %v264_v43 }
  0xcb   :  { %v549_v48 = vpack.c.bf16 %v313_v46, %v311_v45 }
  0xcc   :  { %v283_v49 = vpop.f32.mrf.mxu2 }
  0xcd   :  { %577 = vst [vmem:[%s812_s3 + $0x10] sm:$0xff] %v549_v48   ;;  %v284_v50 = vadd.f32 %v767_v2, %v283_v49  ;;  %v332_v51 = vpop.f32.mrf.mxu3 }
  0xce   :  { %v266_v52 = vpop.f32.mrf.mxu0 }
  0xcf   :  { %v333_v54 = vadd.f32 %v332_v51, %v284_v50  ;;  %v315_v55 = vpop.f32.mrf.mxu1  ;;  %v267_v58 = vadd.f32 %v767_v2, %v266_v52 }
  0xd1   :  { %v569_v56 = vpack.c.bf16 %v333_v54, %v331_v53  ;;  %v316_v63 = vadd.f32 %v315_v55, %v267_v58 }
  0xd3   :  { %581 = vst [vmem:[%s812_s3 + $0x30] sm:$0xff] %v569_v56  }
  0xd4   :  { %v286_v57 = vpop.f32.mrf.mxu2 }
  0xd5   :  { %v335_v59 = vpop.f32.mrf.mxu3  ;;  %v287_v1 = vadd.f32 %v767_v2, %v286_v57 }
  0xd6   :  { %v268_v60 = vpop.f32.mrf.mxu0 }
  0xd7   :  { %v269_v61 = vadd.f32 %v767_v2, %v268_v60  ;;  %v317_v62 = vpop.f32.mrf.mxu1  ;;  %v336_v7 = vadd.f32 %v335_v59, %v287_v1 }
  0xd9   :  { %v318_v0 = vadd.f32 %v317_v62, %v269_v61 }
  0xdb   :  { %v554_v3 = vpack.c.bf16 %v318_v0, %v316_v63 }
  0xdc   :  { %v288_v4 = vpop.f32.mrf.mxu2 }
  0xdd   :  { %578 = vst [vmem:[%s812_s3 + $0x18] sm:$0xff] %v554_v3   ;;  %v289_v5 = vadd.f32 %v767_v2, %v288_v4  ;;  %v337_v6 = vpop.f32.mrf.mxu3 }
  0xdf   :  { %v338_v8 = vadd.f32 %v337_v6, %v289_v5 }
  0xe1   :  { %v574_v9 = vpack.c.bf16 %v338_v8, %v336_v7 }
  0xe3   :  { %582 = vst [vmem:[%s812_s3 + $0x38] sm:$0xff] %v574_v9  }

// kernel: _lambda_.3
= control target key start
LH: loop header
LB: loop body
LE: loop exit
PB: predicated region body
PF: predicated region fallthrough
CT: control target
= control target key end

     0   :  { %s800_s12 = smov 0   ;;  %s802_s13 = smov 0   ;;  %s922_s0 = inlined_call_operand.vmem [shape: bf16[4,2,5,5,128], index: 0, kind: input, shape index: {}]   ;;  %s923_s1 = inlined_call_operand.vmem [shape: bf16[128,128], index: 1, kind: input, shape index: {}]   ;;  %s924_s2 = inlined_call_operand.vmem [shape: f32[1,128], index: 2, kind: input, shape index: {}]   ;;  %s925_s3 = inlined_call_operand.vmem [shape: f32[2,4,4,128], index: 3, kind: output, shape index: {}]  }
   0x1   :  { %s804_s14 = smov 0  }
   0x2 LB: > { %s640_s15 = sadd.s32 4294967295, %s778_s14   ;;  %s817_s16 = sadd.s32 1, %s778_s14   ;;  %s778_s14 = sphi %s804_s14, %s928_s14   ;;  %s774_s13 = sphi %s802_s13, %s927_s13   ;;  %s770_s12 = sphi %s800_s12, %s926_s12  }
   0x3   : > { %s17_s17 = ssub.s32 %s778_s14, %s817_s16  ;;  %s20_s18 = sadd.s32 1, %s774_s13 }
   0x4   : > { %p18_p0 = scmp.eq.s32.totalorder %s17_s17, 0  ;;  %p27_p1 = scmp.ne.s32.totalorder %s774_s13, %s770_s12 }
   0x5   : > { %p28_p2 = scmp.eq.s32.totalorder %s778_s14, 0  ;;  %p643_p4 = scmp.ge.s32.totalorder %s778_s14, 2 }
   0x6   : > { %s826_s19 = scalar_select %p18_p0, %s774_s13, %s20_s18  }
   0x7   : > { %p29_p3 = por %p28_p2, %p27_p1  ;;  %127 = sbr.rel (%p643_p4) target bundleno = 29 (0x1d), region = 24 }
   0xc   : > { %130 = sbr.rel (!%p29_p3) target bundleno = 29 (0x1d), region = 28  ;;  %s132_s20 = sand.u32 (%p29_p3), 1, %s774_s13  }
   0xd   : > { %s729_s21 = smul.u32 (%p29_p3), 20, %s778_s14 }
   0xe   : > { %s728_s22 = smul.u32 (%p29_p3), 80, %s132_s20 }
   0xf   : > { %s137_s25 = scalar_lea.vmem (%p29_p3), %s922_s0, %s729_s21 }
  0x10   : > { %v154_v0 = vld [vmem:[%s137_s25] sm:$0xff] (%p29_p3)   ;;  %v158_v1 = vld [vmem:[%s137_s25 + $0x8] sm:$0xff] (%p29_p3)   ;;  %v162_v2 = vld [vmem:[%s137_s25 + $0x10] sm:$0xf] (%p29_p3)  ;;  %s134_s26 = scalar_lea.vmem (%p29_p3), [#allocation2], %s728_s22 }
  0x11   : > { %155 = vst [vmem:[%s134_s26] sm:$0xff] %v154_v0   ;;  %v164_v3 = vld [vmem:[%s137_s25 + $0x28] sm:$0xff]   ;;  %v168_v4 = vld [vmem:[%s137_s25 + $0x30] sm:$0xff]   ;;  %v172_v5 = vld [vmem:[%s137_s25 + $0x38] sm:$0xf] }
  0x12   : > { %159 = vst [vmem:[%s134_s26 + $0x8] sm:$0xff] %v158_v1   ;;  %v174_v6 = vld [vmem:[%s137_s25 + $0x50] sm:$0xff]   ;;  %v178_v7 = vld [vmem:[%s137_s25 + $0x58] sm:$0xff]   ;;  %v182_v8 = vld [vmem:[%s137_s25 + $0x60] sm:$0xf] }
  0x13   : > { %163 = vst [vmem:[%s134_s26 + $0x10] sm:$0xf] %v162_v2  ;;  %v184_v9 = vld [vmem:[%s137_s25 + $0x78] sm:$0xff]   ;;  %v188_v10 = vld [vmem:[%s137_s25 + $0x80] sm:$0xff]   ;;  %v192_v11 = vld [vmem:[%s137_s25 + $0x88] sm:$0xf] }
  0x14   : > { %165 = vst [vmem:[%s134_s26 + $0x14] sm:$0xff] %v164_v3  }
  0x15   : > { %169 = vst [vmem:[%s134_s26 + $0x1c] sm:$0xff] %v168_v4  }
  0x16   : > { %173 = vst [vmem:[%s134_s26 + $0x24] sm:$0xf] %v172_v5 }
  0x17   : > { %175 = vst [vmem:[%s134_s26 + $0x28] sm:$0xff] %v174_v6  }
  0x18   : > { %179 = vst [vmem:[%s134_s26 + $0x30] sm:$0xff] %v178_v7  }
  0x19   : > { %183 = vst [vmem:[%s134_s26 + $0x38] sm:$0xf] %v182_v8 }
  0x1a   : > { %185 = vst [vmem:[%s134_s26 + $0x3c] sm:$0xff] %v184_v9  }
  0x1b   : > { %189 = vst [vmem:[%s134_s26 + $0x44] sm:$0xff] %v188_v10  }
  0x1c   : > { %193 = vst [vmem:[%s134_s26 + $0x4c] sm:$0xf] %v192_v11 }
  0x1d PF: > { %p645_p5 = scmp.ge.s32.totalorder %s778_s14, 1  ;;  %p256_p6 = scmp.lt.s32.totalorder %s778_s14, 3 }
  0x1f   : > { %p257_p7 = pnand %p645_p5, %p256_p6 }
  0x20   : > { %s263_s29 = sand.u32 (!%p257_p7), 1, %s770_s12   ;;  %p286_p8 = scmp.lt.s32.totalorder (!%p257_p7), %s640_s15, 1 }
  0x21   : > { %260 = sbr.rel (%p257_p7) target bundleno = 211 (0xd3), region = 69 }
  0x22   : > { %s730_s30 = smul.u32 (!%p257_p7), 80, %s263_s29 }
  0x24   : > { %s843_s6 = scalar_lea.vmem (!%p257_p7), [#allocation2], %s730_s30 }
  0x26   : > { %v727_v12 = vld [vmem:[%s923_s1 + $0x38] sm:$0xff]  ;;  %v726_v13 = vld [vmem:[%s923_s1 + $0x30] sm:$0xff]  ;;  %v725_v22 = vld [vmem:[%s923_s1 + $0x28] sm:$0xff]  ;;  %s930_s15 = smov (!%p286_p8, %s640_s15), 1 }
  0x27   : > { %400 = vmatpush.bf16.msra.mxu0 %v727_v12  ;;  %454 = vmatpush.bf16.msra.mxu1 %v727_v12  ;;  %v308_v14 = vld [vmem:[%s843_s6] sm:$0x3]  ;;  %v648_v15 = vld [vmem:[%s843_s6 + $0x14] sm:$0x3]  ;;  %v649_v20 = vld [vmem:[%s843_s6 + $0x28] sm:$0x3] }
  0x28   : > { %509 = vmatpush.bf16.msra.mxu2 %v727_v12  ;;  %564 = vmatpush.bf16.msra.mxu3 %v727_v12  ;;  %v314_v16 = vld [vmem:[%s843_s6] sm:$0x7]  ;;  %v309_v17 = vunpack.c.l.bf16 %v308_v14  ;;  %v312_v18 = vunpack.c.l.bf16 %v648_v15  ;;  %v651_v21 = vld [vmem:[%s843_s6 + $0x28] sm:$0x7]  ;;  %v650_v23 = vld [vmem:[%s843_s6 + $0x3c] sm:$0x3]  ;;  %v322_v26 = vunpack.c.l.bf16 %v649_v20 }
  0x29   : > { %v315_v19 = vunpack.c.l.bf16 %v314_v16  ;;  %v329_v27 = vunpack.c.l.bf16 %v651_v21  ;;  %v687_v28 = vld [vmem:[%s843_s6 + $0x4] sm:$0x3]  ;;  %v688_v29 = vld [vmem:[%s843_s6 + $0x18] sm:$0x3]  ;;  %v690_v33 = vld [vmem:[%s843_s6 + $0x2c] sm:$0x3]  ;;  %v326_v35 = vunpack.c.l.bf16 %v650_v23 }
  0x2a   : > { %v313_v24 = vmax.f32 %v309_v17, %v312_v18  ;;  %v415_v30 = vunpack.c.l.bf16 %v687_v28  ;;  %v417_v31 = vunpack.c.l.bf16 %v688_v29  ;;  %v689_v32 = vld [vmem:[%s843_s6 + $0x4] sm:$0x7]  ;;  %v692_v39 = vld [vmem:[%s843_s6 + $0x2c] sm:$0x7]  ;;  %v691_v42 = vld [vmem:[%s843_s6 + $0x40] sm:$0x3]  ;;  %v427_v48 = vunpack.c.l.bf16 %v690_v33 }
  0x2b   : > { %401 = vmatpush.bf16.msra.mxu0 %v726_v13  ;;  %455 = vmatpush.bf16.msra.mxu1 %v726_v13  ;;  %v317_v25 = vrot.slane %v315_v19, 1  ;;  %v652_v36 = vld [vmem:[%s843_s6 + $0x4] sm:$0x3]  ;;  %v420_v38 = vunpack.c.l.bf16 %v689_v32  ;;  %v434_v43 = vunpack.c.l.bf16 %v692_v39  ;;  %v695_v44 = vld [vmem:[%s843_s6 + $0x8] sm:$0x7]  ;;  %v331_v46 = vrot.slane %v329_v27, 1 }
  0x2c   : > { %510 = vmatpush.bf16.msra.mxu2 %v726_v13  ;;  %565 = vmatpush.bf16.msra.mxu3 %v726_v13  ;;  %v860_v37 = vld [vmem:[%s843_s6 + $0x4] sm:$0x7]  ;;  %v418_v41 = vmax.f32 %v415_v30, %v417_v31  ;;  %v697_v49 = vld [vmem:[%s843_s6 + $0x8] sm:$0x3]  ;;  %v698_v50 = vld [vmem:[%s843_s6 + $0x1c] sm:$0x3]  ;;  %v336_v51 = vunpack.c.l.bf16 %v652_v36  ;;  %v431_v60 = vunpack.c.l.bf16 %v691_v42  ;;  %v448_v4 = vunpack.c.l.bf16 %v695_v44 }
  0x2d   : > { %v319_v34 = vmax.f32 %v313_v24, %v317_v25  ;;  %v724_v40 = vld [vmem:[%s923_s1 + $0x20] sm:$0xff]  ;;  %v422_v47 = vrot.slane %v420_v38, 1  ;;  %v653_v52 = vld [vmem:[%s843_s6 + $0x18] sm:$0x3]  ;;  %v343_v53 = vunpack.c.l.bf16 %v860_v37  ;;  %v470_v54 = vunpack.c.l.bf16 %v697_v49  ;;  %v699_v56 = vld [vmem:[%s843_s6 + $0x8] sm:$0x7] }
  0x2e   : > { %v472_v55 = vunpack.c.l.bf16 %v698_v50  ;;  %v700_v57 = vld [vmem:[%s843_s6 + $0x30] sm:$0x3]  ;;  %v693_v61 = vld [vmem:[%s843_s6 + $0x8] sm:$0x3]  ;;  %v475_v62 = vunpack.c.l.bf16 %v699_v56  ;;  %v701_v63 = vld [vmem:[%s843_s6 + $0x44] sm:$0x3]  ;;  %v340_v13 = vunpack.c.l.bf16 %v653_v52 }
  0x2f   : > { %402 = vmatpush.bf16.msra.mxu0 %v725_v22  ;;  %456 = vmatpush.bf16.msra.mxu1 %v725_v22  ;;  %v323_v45 = vmax.f32 %v319_v34, %v322_v26  ;;  %v424_v59 = vmax.f32 %v418_v41, %v422_v47  ;;  %v702_v0 = vld [vmem:[%s843_s6 + $0x30] sm:$0x7]  ;;  %v723_v1 = vld [vmem:[%s923_s1 + $0x18] sm:$0xff]  ;;  %v436_v2 = vrot.slane %v434_v43, 1  ;;  %v482_v6 = vunpack.c.l.bf16 %v700_v57  ;;  %v708_v12 = vld [vmem:[%s843_s6 + $0x20] sm:$0x3] }
  0x30   : > { %511 = vmatpush.bf16.msra.mxu2 %v725_v22  ;;  %566 = vmatpush.bf16.msra.mxu3 %v725_v22  ;;  %v694_v3 = vld [vmem:[%s843_s6 + $0x1c] sm:$0x3]  ;;  %v473_v5 = vmax.f32 %v470_v54, %v472_v55  ;;  %v477_v9 = vrot.slane %v475_v62, 1  ;;  %v489_v10 = vunpack.c.l.bf16 %v702_v0  ;;  %v707_v11 = vld [vmem:[%s843_s6 + $0xc] sm:$0x3]  ;;  %v441_v14 = vunpack.c.l.bf16 %v693_v61  ;;  %v722_v25 = vld [vmem:[%s923_s1 + $0x10] sm:$0xff] }
  0x31   : > { %v327_v58 = vmax.f32 %v323_v45, %v326_v35  ;;  %v428_v8 = vmax.f32 %v424_v59, %v427_v48  ;;  %v486_v15 = vunpack.c.l.bf16 %v701_v63  ;;  %v703_v16 = vld [vmem:[%s843_s6 + $0xc] sm:$0x3]  ;;  %v525_v17 = vunpack.c.l.bf16 %v707_v11  ;;  %v710_v23 = vld [vmem:[%s843_s6 + $0x34] sm:$0x3]  ;;  %v711_v35 = vld [vmem:[%s843_s6 + $0x48] sm:$0x3] }
  0x32   : > { %v709_v18 = vld [vmem:[%s843_s6 + $0xc] sm:$0x7]  ;;  %v479_v21 = vmax.f32 %v473_v5, %v477_v9  ;;  %v527_v22 = vunpack.c.l.bf16 %v708_v12  ;;  %v712_v24 = vld [vmem:[%s843_s6 + $0x34] sm:$0x7]  ;;  %v345_v26 = vrot.slane %v343_v53, 1  ;;  %v445_v27 = vunpack.c.l.bf16 %v694_v3  ;;  %s719_s24 = sshll.u32 %s930_s15, 4 }
  0x33   : > { %403 = vmatpush.bf16.msra.mxu0 %v724_v40  ;;  %457 = vmatpush.bf16.msra.mxu1 %v724_v40  ;;  %v333_v7 = vmax.f32 %v327_v58, %v331_v46  ;;  %v432_v20 = vmax.f32 %v428_v8, %v431_v60  ;;  %v450_v28 = vrot.slane %v448_v4, 1  ;;  %v705_v29 = vld [vmem:[%s843_s6 + $0xc] sm:$0x7]  ;;  %v530_v30 = vunpack.c.l.bf16 %v709_v18  ;;  %v704_v36 = vld [vmem:[%s843_s6 + $0x20] sm:$0x3]  ;;  %s290_s29 = scalar_lea.vmem %s925_s3, %s719_s24 }
  0x34   : > { %512 = vmatpush.bf16.msra.mxu2 %v724_v40  ;;  %567 = vmatpush.bf16.msra.mxu3 %v724_v40  ;;  %v483_v32 = vmax.f32 %v479_v21, %v482_v6  ;;  %v491_v33 = vrot.slane %v489_v10, 1  ;;  %v496_v34 = vunpack.c.l.bf16 %v703_v16  ;;  %v528_v37 = vmax.f32 %v525_v17, %v527_v22  ;;  %v721_v45 = vld [vmem:[%s923_s1 + $0x8] sm:$0xff]  ;;  %v715_v52 = vld [vmem:[%s843_s6 + $0x10] sm:$0x7]  ;;  %v714_v59 = vld [vmem:[%s843_s6 + $0x24] sm:$0x3] }
  0x35   : > { %v337_v19 = vmax.f32 %v333_v7, %v336_v51  ;;  %v438_v31 = vmax.f32 %v432_v20, %v436_v2  ;;  %v532_v38 = vrot.slane %v530_v30, 1  ;;  %v537_v39 = vunpack.c.l.bf16 %v710_v23  ;;  %v713_v51 = vld [vmem:[%s843_s6 + $0x10] sm:$0x3] }
  0x36   : > { %v544_v40 = vunpack.c.l.bf16 %v712_v24  ;;  %v487_v43 = vmax.f32 %v483_v32, %v486_v15  ;;  %v503_v44 = vunpack.c.l.bf16 %v705_v29  ;;  %v541_v47 = vunpack.c.l.bf16 %v711_v35  ;;  %v720_v60 = vld [vmem:[%s923_s1] sm:$0xff] }
  0x37   : > { %404 = vmatpush.bf16.msra.mxu0 %v723_v1  ;;  %458 = vmatpush.bf16.msra.mxu1 %v723_v1  ;;  %v341_v41 = vmax.f32 %v337_v19, %v340_v13  ;;  %v442_v42 = vmax.f32 %v438_v31, %v441_v14  ;;  %v534_v46 = vmax.f32 %v528_v37, %v532_v38  ;;  %v500_v50 = vunpack.c.l.bf16 %v704_v36  ;;  %v755_v12 = vld [vmem:[%s924_s2] ss:$0 sm:$0xff] }
  0x38   : > { %513 = vmatpush.bf16.msra.mxu2 %v723_v1  ;;  %568 = vmatpush.bf16.msra.mxu3 %v723_v1  ;;  %v493_v49 = vmax.f32 %v487_v43, %v491_v33  ;;  %v546_v54 = vrot.slane %v544_v40, 1  ;;  %v505_v58 = vrot.slane %v503_v44, 1  ;;  %v551_v62 = vunpack.c.l.bf16 %v713_v51 }
  0x39   : > { %v446_v48 = vmax.f32 %v442_v42, %v445_v27  ;;  %v538_v53 = vmax.f32 %v534_v46, %v537_v39  ;;  %v347_v55 = vmax.f32 %v341_v41, %v345_v26  ;;  %v558_v63 = vunpack.c.l.bf16 %v715_v52 }
  0x3a   : > { %v497_v57 = vmax.f32 %v493_v49, %v496_v34  ;;  %v555_v2 = vunpack.c.l.bf16 %v714_v59 }
  0x3b   : > { %405 = vmatpush.bf16.msra.mxu0 %v722_v25  ;;  %459 = vmatpush.bf16.msra.mxu1 %v722_v25  ;;  %v452_v56 = vmax.f32 %v446_v48, %v450_v28  ;;  %v542_v61 = vmax.f32 %v538_v53, %v541_v47  ;;  %v348_v3 = vpack.c.bf16 %v347_v55, %v347_v55  ;;  %v560_v7 = vrot.slane %v558_v63, 1 }
  0x3c   : > { %514 = vmatpush.bf16.msra.mxu2 %v722_v25  ;;  %569 = vmatpush.bf16.msra.mxu3 %v722_v25  ;;  %v501_v0 = vmax.f32 %v497_v57, %v500_v50 }
  0x3d   : > { %v548_v1 = vmax.f32 %v542_v61, %v546_v54  ;;  %v453_v4 = vpack.c.bf16 %v452_v56, %v452_v56 }
  0x3e   : > { %v507_v5 = vmax.f32 %v501_v0, %v505_v58 }
  0x3f   : > { %406 = vmatpush.bf16.msra.mxu0 %v721_v45  ;;  %460 = vmatpush.bf16.msra.mxu1 %v721_v45  ;;  %v552_v6 = vmax.f32 %v548_v1, %v551_v62 }
  0x40   : > { %515 = vmatpush.bf16.msra.mxu2 %v721_v45  ;;  %570 = vmatpush.bf16.msra.mxu3 %v721_v45  ;;  %v508_v8 = vpack.c.bf16 %v507_v5, %v507_v5 }
  0x41   : > { %v556_v9 = vmax.f32 %v552_v6, %v555_v2 }
  0x43   : > { %407 = vmatpush.bf16.msra.mxu0 %v720_v60  ;;  %461 = vmatpush.bf16.msra.mxu1 %v720_v60  ;;  %v562_v10 = vmax.f32 %v556_v9, %v560_v7 }
  0x44   : > { %516 = vmatpush.bf16.msra.mxu2 %v720_v60  ;;  %571 = vmatpush.bf16.msra.mxu3 %v720_v60 }
  0x45   : > { %v563_v11 = vpack.c.bf16 %v562_v10, %v562_v10 }
  0x46   : > { %408 = vmatmul.bf16.vlgmr.msra.gmra.mxu0 %v348_v3  ;;  %462 = vmatmul.bf16.vlgmr.msra.gmra.mxu1 %v453_v4 }
  0x47   : > { %517 = vmatmul.bf16.vlgmr.msra.gmra.mxu2 %v508_v8  ;;  %572 = vmatmul.bf16.vlgmr.msra.gmra.mxu3 %v563_v11 }
  0xc3   : > { %v409_v13 = vpop.f32.mrf.mxu0  ;;  %v463_v14 = vpop.f32.mrf.mxu1 }
  0xc4   : > { %v410_v15 = vadd.f32 %v755_v12, %v409_v13  ;;  %v464_v16 = vadd.f32 %v755_v12, %v463_v14 }
  0xc6   : > { %413 = vst [vmem:[%s290_s29] sm:$0xf] %v410_v15 }
  0xc7   : > { %696 = vst [vmem:[%s290_s29 + $0x4] sm:$0xf] %v464_v16 }
  0xca   : > { %v518_v17 = vpop.f32.mrf.mxu2  ;;  %v573_v21 = vpop.f32.mrf.mxu3 }
  0xcb   : > { %v519_v18 = vadd.f32 %v755_v12, %v518_v17  ;;  %v411_v19 = vpop.f32.mrf.mxu0  ;;  %v465_v20 = vpop.f32.mrf.mxu1  ;;  %v574_v22 = vadd.f32 %v755_v12, %v573_v21 }
  0xcd   : > { %706 = vst [vmem:[%s290_s29 + $0x8] sm:$0xf] %v519_v18 }
  0xce   : > { %716 = vst [vmem:[%s290_s29 + $0xc] sm:$0xf] %v574_v22 }
  0xd2   : > { %v520_v23 = vpop.f32.mrf.mxu2  ;;  %v575_v24 = vpop.f32.mrf.mxu3 }
  0xd3 PF: > { %p10_p9 = scmp.ge.s32.totalorder %s817_s16, 4   ;;  %s926_s12 = smov %s774_s13 }
  0xd4   : > { %s927_s13 = smov %s826_s19  ;;  %s928_s14 = smov %s817_s16 }
  0xd5   :  { %12 = sbr.rel (!%p10_p9) target bundleno = 2 (0x2), region = 128 }

</bundles_post_ra>
